<compile_context>
chip_gen: v7x
topology: tpu7x:2x2x1
jax: 0.10.0
libtpu: 0.0.40
codegen_flags: <defaults>
</compile_context>

<pallas_src>
import jax
import jax.numpy as jnp
from jax import lax
from jax.experimental import pallas as pl
from jax.experimental.pallas import tpu as pltpu


def _round_up(n: int, m: int) -> int:
    return ((n + m - 1) // m) * m


def wr_mlp_kernel(x_ref, w1_ref, b1_ref, w2c_ref, b2_ref, oT_ref):
    """relu(W2 @ relu(W1 @ x^T + b1) + b2) for one batch tile, batch on the lane axis."""
    x = x_ref[...]                                            # (TB, 44), native layout
    # Layer 1 on the MXU: contract feature dims -> (22, TB), batch on lanes.
    h = lax.dot_general(
        w1_ref[...], x,
        dimension_numbers=(((1,), (1,)), ((), ())),
        preferred_element_type=jnp.float32,
        precision=lax.Precision.HIGHEST)                      # (22, TB)
    h = jnp.maximum(h + b1_ref[...], 0.0)                     # ReLU; b1 (22,1) lane-bcast
    # Layer 2 on VPU + XLU: (1,22)x(22,TB) as broadcast-mul + sublane reduction
    # (keeps the tiny second matmul off the MXU drain path; helps most on v5e).
    y = jnp.sum(h * w2c_ref[...], axis=0, keepdims=True)      # (1, TB)
    oT_ref[...] = jnp.maximum(y + b2_ref[...], 0.0)           # ReLU; b2 (1,1)


def wr_model_forward(x, w1, b1, w2, b2, *, tb=8192, min_grid_steps=4):
    """x: (B, 44) f32.  w1: (22, 44), b1: (22,), w2: (1, 22), b2: (1,)  (PyTorch layout).

    Returns (B, 1) f32, identical semantics to WRModel.forward.
    """
    B, in_f = x.shape
    hid = w1.shape[0]

    # Batch tile: multiple of 128 lanes; large enough to amortize per-step pipeline
    # overhead, capped so there are >= min_grid_steps grid steps for v7x megacore
    # sharding and so double-buffered tiles fit VMEM on all generations.
    tb_eff = max(128, min(tb, _round_up(pl.cdiv(B, min_grid_steps), 128)))
    grid = pl.cdiv(B, tb_eff)          # ragged tail handled by the grid, no jnp.pad

    xc = x.astype(jnp.float32)                                # (B, 44)
    w1c = w1.astype(jnp.float32)                              # (22, 44)
    b1c = b1.reshape(hid, 1).astype(jnp.float32)              # (22, 1)
    w2c = w2.reshape(hid, 1).astype(jnp.float32)              # (22, 1) column (VPU path)
    b2c = b2.reshape(1, 1).astype(jnp.float32)                # (1, 1)

    resident = lambda i: (0, 0)   # params: same block every step -> DMA'd once

    outT = pl.pallas_call(
        wr_mlp_kernel,
        out_shape=jax.ShapeDtypeStruct((1, B), jnp.float32),
        grid=(grid,),
        in_specs=[
            pl.BlockSpec((tb_eff, in_f), lambda i: (i, 0)),   # x tiles, pipelined
            pl.BlockSpec((hid, in_f), resident),              # W1 resident
            pl.BlockSpec((hid, 1), resident),                 # b1 resident
            pl.BlockSpec((hid, 1), resident),                 # W2 column resident
            pl.BlockSpec((1, 1), resident),                   # b2 resident
        ],
        out_specs=pl.BlockSpec((1, tb_eff), lambda i: (0, i)),  # lane-dense output
        compiler_params=pltpu.CompilerParams(
            dimension_semantics=("parallel",)),                  # shard batch across TCs
    )(xc, w1c, b1c, w2c, b2c)

    return outT.reshape(B, 1)


def init_params(key):
    """Mimic PyTorch nn.Linear default init: U(-1/sqrt(fan_in), 1/sqrt(fan_in))."""
    k1, k2, k3, k4 = jax.random.split(key, 4)
    bound1 = 1.0 / jnp.sqrt(44.0)
    bound2 = 1.0 / jnp.sqrt(22.0)
    w1 = jax.random.uniform(k1, (22, 44), jnp.float32, -bound1, bound1)  # (out, in)
    b1 = jax.random.uniform(k2, (22,), jnp.float32, -bound1, bound1)
    w2 = jax.random.uniform(k3, (1, 22), jnp.float32, -bound2, bound2)
    b2 = jax.random.uniform(k4, (1,), jnp.float32, -bound2, bound2)
    return w1, b1, w2, b2


def reference_forward(x, w1, b1, w2, b2):
    h = jnp.maximum(jnp.dot(x, w1.T, precision=lax.Precision.HIGHEST) + b1, 0.0)
    return jnp.maximum(jnp.dot(h, w2.T, precision=lax.Precision.HIGHEST) + b2, 0.0)


if __name__ == "__main__":
    key = jax.random.PRNGKey(0)
    kx, kp, kx2 = jax.random.split(key, 3)
    w1, b1, w2, b2 = init_params(kp)

    # Small case: single (partial) tile, exercises OOB input rows on the lone block.
    B = 8
    x = jax.random.normal(kx, (B, 44), jnp.float32)
    out = jax.block_until_ready(wr_model_forward(x, w1, b1, w2, b2))
    ref = reference_forward(x, w1, b1, w2, b2)
    assert out.shape == (B, 1)
    assert jnp.allclose(out, ref, atol=1e-5, rtol=1e-5)

    # Ragged batch across multiple grid steps (cdiv grid + discarded OOB edge writes).
    B2 = 300
    x2 = jax.random.normal(kx2, (B2, 44), jnp.float32)
    out2 = jax.block_until_ready(wr_model_forward(x2, w1, b1, w2, b2))
    ref2 = reference_forward(x2, w1, b1, w2, b2)
    assert out2.shape == (B2, 1)
    assert jnp.allclose(out2, ref2, atol=1e-5, rtol=1e-5)

    print("KERNEL_OK")
</pallas_src>

<mosaic_0001>
module attributes {stable_mosaic.version = 11 : i64} {
  func.func @wr_mlp_kernel(%arg0: i32, %arg1: memref<128x44xf32, #tpu.memory_space<vmem>>, %arg2: memref<22x44xf32, #tpu.memory_space<vmem>>, %arg3: memref<22x1xf32, #tpu.memory_space<vmem>>, %arg4: memref<22x1xf32, #tpu.memory_space<vmem>>, %arg5: memref<1x1xf32, #tpu.memory_space<vmem>>, %arg6: memref<1x128xf32, #tpu.memory_space<vmem>>) attributes {dimension_semantics = [#tpu.dimension_semantics<parallel>], iteration_bounds = array<i64: 1>, scalar_prefetch = 0 : i64, scratch_operands = 0 : i64, tpu.core_type = #tpu.core_type<tc>, window_params = [{transform_indices = @transform_0, window_bounds = array<i64: 128, 44>}, {pipeline_mode = #tpu.pipeline_mode<synchronous>, transform_indices = @transform_1, window_bounds = array<i64: 22, 44>}, {pipeline_mode = #tpu.pipeline_mode<synchronous>, transform_indices = @transform_2, window_bounds = array<i64: 22, 1>}, {pipeline_mode = #tpu.pipeline_mode<synchronous>, transform_indices = @transform_3, window_bounds = array<i64: 22, 1>}, {pipeline_mode = #tpu.pipeline_mode<synchronous>, transform_indices = @transform_4, window_bounds = array<i64: 1, 1>}, {transform_indices = @transform_5, window_bounds = array<i64: 1, 128>}]} {
    %c0 = arith.constant 0 : index
    %c0_0 = arith.constant 0 : index
    %0 = vector.load %arg1[%c0, %c0_0] : memref<128x44xf32, #tpu.memory_space<vmem>>, vector<128x44xf32>
    %c0_1 = arith.constant 0 : index
    %c0_2 = arith.constant 0 : index
    %1 = vector.load %arg2[%c0_1, %c0_2] : memref<22x44xf32, #tpu.memory_space<vmem>>, vector<22x44xf32>
    %cst = arith.constant dense<0.000000e+00> : vector<22x128xf32>
    %2 = tpu.matmul %1, %0, %cst {dimension_numbers = #tpu.dot_dimension_numbers<[1], [1], [0], [0], [0, 0, 1, 0], [], []>, precision = #tpu.contract_precision<fp32>} : vector<22x44xf32>, vector<128x44xf32>, vector<22x128xf32> -> vector<22x128xf32>
    %c0_3 = arith.constant 0 : index
    %c0_4 = arith.constant 0 : index
    %3 = vector.load %arg3[%c0_3, %c0_4] : memref<22x1xf32, #tpu.memory_space<vmem>>, vector<22x1xf32>
    %4 = vector.broadcast %3 : vector<22x1xf32> to vector<22x128xf32>
    %5 = arith.addf %2, %4 : vector<22x128xf32>
    %cst_5 = arith.constant 0.000000e+00 : f32
    %6 = vector.broadcast %cst_5 : f32 to vector<22x128xf32>
    %7 = arith.maximumf %5, %6 : vector<22x128xf32>
    %c0_6 = arith.constant 0 : index
    %c0_7 = arith.constant 0 : index
    %8 = vector.load %arg4[%c0_6, %c0_7] : memref<22x1xf32, #tpu.memory_space<vmem>>, vector<22x1xf32>
    %9 = vector.broadcast %8 : vector<22x1xf32> to vector<22x128xf32>
    %10 = arith.mulf %7, %9 : vector<22x128xf32>
    %cst_8 = arith.constant dense<0.000000e+00> : vector<128xf32>
    %11 = vector.multi_reduction <add>, %10, %cst_8 [0] : vector<22x128xf32> to vector<128xf32>
    %12 = vector.shape_cast %11 : vector<128xf32> to vector<1x128xf32>
    %c0_9 = arith.constant 0 : index
    %c0_10 = arith.constant 0 : index
    %13 = vector.load %arg5[%c0_9, %c0_10] : memref<1x1xf32, #tpu.memory_space<vmem>>, vector<1x1xf32>
    %14 = vector.broadcast %13 : vector<1x1xf32> to vector<1x128xf32>
    %15 = arith.addf %12, %14 : vector<1x128xf32>
    %cst_11 = arith.constant 0.000000e+00 : f32
    %16 = vector.broadcast %cst_11 : f32 to vector<1x128xf32>
    %17 = arith.maximumf %15, %16 : vector<1x128xf32>
    %c0_12 = arith.constant 0 : index
    %c0_13 = arith.constant 0 : index
    %18 = vector.load %arg6[%c0_12, %c0_13] : memref<1x128xf32, #tpu.memory_space<vmem>>, vector<1x128xf32>
    tpu.vector_store %arg6[%c0_12, %c0_13], %17 {strides = array<i32>} : memref<1x128xf32, #tpu.memory_space<vmem>>, vector<1x128xf32>,
    return
  }
  func.func @transform_0(%arg0: i32) -> (i32, i32) {
    %c0_i32 = arith.constant 0 : i32
    %c0_i32_0 = arith.constant 0 : i32
    return %arg0, %c0_i32 : i32, i32
  }
  func.func @transform_1(%arg0: i32) -> (i32, i32) {
    %c0_i32 = arith.constant 0 : i32
    %c0_i32_0 = arith.constant 0 : i32
    %c0_i32_1 = arith.constant 0 : i32
    return %c0_i32, %c0_i32_0 : i32, i32
  }
  func.func @transform_2(%arg0: i32) -> (i32, i32) {
    %c0_i32 = arith.constant 0 : i32
    %c0_i32_0 = arith.constant 0 : i32
    %c0_i32_1 = arith.constant 0 : i32
    return %c0_i32, %c0_i32_0 : i32, i32
  }
  func.func @transform_3(%arg0: i32) -> (i32, i32) {
    %c0_i32 = arith.constant 0 : i32
    %c0_i32_0 = arith.constant 0 : i32
    %c0_i32_1 = arith.constant 0 : i32
    return %c0_i32, %c0_i32_0 : i32, i32
  }
  func.func @transform_4(%arg0: i32) -> (i32, i32) {
    %c0_i32 = arith.constant 0 : i32
    %c0_i32_0 = arith.constant 0 : i32
    %c0_i32_1 = arith.constant 0 : i32
    return %c0_i32, %c0_i32_0 : i32, i32
  }
  func.func @transform_5(%arg0: i32) -> (i32, i32) {
    %c0_i32 = arith.constant 0 : i32
    %c0_i32_0 = arith.constant 0 : i32
    return %c0_i32, %arg0 : i32, i32
  }
}

</mosaic_0001>

<bundles_post_ra>
// kernel: tpu_custom_call.1
= control target key start
LH: loop header
LB: loop body
LE: loop exit
PB: predicated region body
PF: predicated region fallthrough
CT: control target
= control target key end

     0   :  { %s1876_s0 = inlined_call_operand.vmem [shape: f32[8,44], index: 0, kind: input, shape index: {}]   ;;  %s1877_s1 = inlined_call_operand.vmem [shape: f32[22,44], index: 1, kind: input, shape index: {}]   ;;  %s1878_s2 = inlined_call_operand.vmem [shape: f32[22,1], index: 2, kind: input, shape index: {}]   ;;  %s1879_s3 = inlined_call_operand.vmem [shape: f32[22,1], index: 3, kind: input, shape index: {}]   ;;  %s1880_s4 = inlined_call_operand.<no memory space> [shape: f32[1,1], index: 4, kind: input, shape index: {}]   ;;  %s1881_s5 = inlined_call_operand.hbm [shape: f32[1,8], index: 5, kind: output, shape index: {}]  }
   0x1   :  { %v10_v0 = vstv %s1880_s4 }
   0x2   :  { %11 = vst [vmem:[#allocation2] sm:$0x1] %v10_v0 }
   0x3   :  { %v23_v1 = vld [vmem:[%s1876_s0] sm:$0xff]  ;;  %v24_v2 = vld [vmem:[%s1876_s0 + $0x8] sm:$0xff]  ;;  %vm60_vm0 = vcmask 359424   ;;  %v25_v3 = vld [vmem:[%s1876_s0 + $0x10] sm:$0xff]  ;;  %v1471_v4 = vmov 0.0|0.0  }
   0x4   :  { %1266 = vmatprep.subr.bf16.mxu1 %v1471_v4  ;;  %1338 = vmatprep.subr.bf16.mxu0 %v1471_v4  ;;  %v71_v5 = vsel %vm60_vm0, %v23_v1, 0  ;;  %v74_v6 = vsel %vm60_vm0, %v24_v2, 0  ;;  %v26_v7 = vld [vmem:[%s1876_s0 + $0x18] sm:$0xff]  ;;  %v77_v10 = vsel %vm60_vm0, %v25_v3, 0 }
   0x5   :  { %v119_v8 = vand.u32 4294901760, %v71_v5  ;;  %v122_v9 = vand.u32 4294901760, %v74_v6  ;;  %v80_v11 = vsel %vm60_vm0, %v26_v7, 0  ;;  %v125_v13 = vand.u32 4294901760, %v77_v10 }
   0x6   :  { %v128_v14 = vand.u32 4294901760, %v80_v11 }
   0x7   :  { %v1527_v12 = vpack.c.bf16 %v122_v9, %v119_v8 }
   0x9   :  { %1268 = vmatpush3.bf16.xpose.msra.mxu1 %v1527_v12  ;;  %1340 = vmatpush3.bf16.xpose.msra.mxu0 %v1527_v12 }
   0xa   :  { %1269 = vmatprep.subr.bf16.mxu1 %v1471_v4  ;;  %1341 = vmatprep.subr.bf16.mxu0 %v1471_v4 }
   0xb   :  { %12 = vsyncpa [#allocation4], 0  ;;  %v27_v15 = vld [vmem:[%s1876_s0 + $0x20] sm:$0xff]  ;;  %v28_v16 = vld [vmem:[%s1876_s0 + $0x28] sm:$0xff]  ;;  %v1539_v17 = vpack.c.bf16 %v128_v14, %v125_v13  ;;  %vm1472_vm1 = vmmov 0   ;;  %v1473_v24 = vmov 0.0   ;;  %v1575_v35 = vsub.f32 %v71_v5, %v119_v8 }
   0xc   :  { %v83_v18 = vsel %vm60_vm0, %v27_v15, 0  ;;  %v86_v19 = vsel %vm60_vm0, %v28_v16, 0  ;;  %v29_v22 = vld [vmem:[%s1876_s0 + $0x30] sm:$0xff]  ;;  %v30_v23 = vld [vmem:[%s1876_s0 + $0x38] sm:$0xff]  ;;  %1052 = vmatprep.mubr.msk.f32.mxu1 %vm1472_vm1, %v1473_v24  ;;  %1175 = vmatprep.mubr.msk.f32.mxu0 %vm1472_vm1, %v1473_v24  ;;  %v31_v30 = vld [vmem:[%s1876_s0 + $0x40] sm:$0xff]  ;;  %v1577_v36 = vsub.f32 %v74_v6, %v122_v9  ;;  %v1585_v39 = vsub.f32 %v77_v10, %v125_v13 }
   0xd   :  { %v131_v20 = vand.u32 4294901760, %v83_v18  ;;  %v134_v21 = vand.u32 4294901760, %v86_v19  ;;  %v89_v26 = vsel %vm60_vm0, %v29_v22, 0  ;;  %v92_v27 = vsel %vm60_vm0, %v30_v23, 0  ;;  %v32_v31 = vld [vmem:[%s1876_s0 + $0x48] sm:$0xff]  ;;  %v33_v37 = vld [vmem:[%s1876_s0 + $0x50] sm:$0xff] }
   0xe   :  { %v137_v28 = vand.u32 4294901760, %v89_v26  ;;  %v140_v29 = vand.u32 4294901760, %v92_v27  ;;  %v95_v33 = vsel %vm60_vm0, %v31_v30, 0  ;;  %v98_v34 = vsel %vm60_vm0, %v32_v31, 0  ;;  %v34_v38 = vld [vmem:[%s1876_s0 + $0x58] sm:$0xff]  ;;  %v35_v61 = vld [vmem:[%s1876_s0 + $0x60] sm:$0xff] }
   0xf   :  { %v1557_v25 = vpack.c.bf16 %v134_v21, %v131_v20  ;;  %v143_v40 = vand.u32 4294901760, %v95_v33  ;;  %v146_v41 = vand.u32 4294901760, %v98_v34  ;;  %v1589_v42 = vsub.f32 %v80_v11, %v128_v14  ;;  %v36_v62 = vld [vmem:[%s1876_s0 + $0x68] sm:$0xff]  ;;  %v39_v6 = vld [vmem:[%s1877_s1] sm:$0xff]  ;;  %v37_v9 = vld [vmem:[%s1876_s0 + $0x70] sm:$0xff] }
  0x10   :  { %v1571_v32 = vpack.c.bf16 %v140_v29, %v137_v28  ;;  %v1591_v43 = vsub.f32 %v83_v18, %v131_v20  ;;  %v1315_v44 = vpack.c.bf16 %v1577_v36, %v1575_v35  ;;  %v1597_v45 = vsub.f32 %v86_v19, %v134_v21  ;;  %v38_v10 = vld [vmem:[%s1876_s0 + $0x78] sm:$0xff]  ;;  %v40_v13 = vld [vmem:[%s1877_s1 + $0x8] sm:$0xff]  ;;  %v41_v23 = vld [vmem:[%s1877_s1 + $0x10] sm:$0x3f] }
  0x11   :  { %1271 = vmatpush3.bf16.xpose.msra.mxu1 %v1539_v17  ;;  %1343 = vmatpush3.bf16.xpose.msra.mxu0 %v1539_v17  ;;  %v1599_v46 = vsub.f32 %v89_v26, %v137_v28  ;;  %v101_v47 = vsel %vm60_vm0, %v33_v37, 0  ;;  %v104_v48 = vsel %vm60_vm0, %v34_v38, 0  ;;  %v1603_v49 = vsub.f32 %v92_v27, %v140_v29 }
  0x12   :  { %1272 = vmatprep.subr.bf16.mxu1 %v1471_v4  ;;  %1344 = vmatprep.subr.bf16.mxu0 %v1471_v4  ;;  %v1605_v50 = vsub.f32 %v95_v33, %v143_v40  ;;  %v1607_v51 = vsub.f32 %v98_v34, %v146_v41  ;;  %v1318_v52 = vpack.c.bf16 %v1589_v42, %v1585_v39  ;;  %v149_v55 = vand.u32 4294901760, %v101_v47 }
  0x13   :  { %v1611_v53 = vpack.c.bf16 %v146_v41, %v143_v40  ;;  %v1321_v54 = vpack.c.bf16 %v1597_v45, %v1591_v43  ;;  %v152_v56 = vand.u32 4294901760, %v104_v48  ;;  %v1324_v57 = vpack.c.bf16 %v1603_v49, %v1599_v46 }
  0x14   :  { %v1327_v58 = vpack.c.bf16 %v1607_v51, %v1605_v50  ;;  %v1619_v59 = vsub.f32 %v101_v47, %v149_v55  ;;  %v107_v0 = vsel %vm60_vm0, %v35_v61, 0  ;;  %v110_v1 = vsel %vm60_vm0, %v36_v62, 0 }
  0x15   :  { %v1621_v60 = vsub.f32 %v104_v48, %v152_v56  ;;  %v1637_v2 = vpack.c.bf16 %v152_v56, %v149_v55  ;;  %v155_v3 = vand.u32 4294901760, %v107_v0  ;;  %v158_v5 = vand.u32 4294901760, %v110_v1 }
  0x16   :  { %v62_v11 = vsel %vm60_vm0, %v39_v6, 0  ;;  %v113_v15 = vsel %vm60_vm0, %v37_v9, 0  ;;  %v116_v16 = vsel %vm60_vm0, %v38_v10, 0  ;;  %v65_v20 = vsel %vm60_vm0, %v40_v13, 0 }
  0x17   :  { %v1330_v63 = vpack.c.bf16 %v1621_v60, %v1619_v59  ;;  %v1642_v7 = vsub.f32 %v107_v0, %v155_v3  ;;  %v1644_v8 = vsub.f32 %v110_v1, %v158_v5  ;;  %v1664_v18 = vand.u32 4294901760, %v62_v11 }
  0x18   :  { %v1666_v19 = vpack.c.bf16 %v158_v5, %v155_v3  ;;  %v161_v21 = vand.u32 4294901760, %v113_v15  ;;  %v164_v22 = vand.u32 4294901760, %v116_v16  ;;  %v1679_v29 = vand.u32 4294901760, %v65_v20 }
  0x19   :  { %1274 = vmatpush3.bf16.xpose.msra.mxu1 %v1557_v25  ;;  %1346 = vmatpush3.bf16.xpose.msra.mxu0 %v1557_v25  ;;  %v1333_v14 = vpack.c.bf16 %v1644_v8, %v1642_v7  ;;  %v1677_v28 = vsub.f32 %v62_v11, %v1664_v18  ;;  %v232_v30 = vand.u32 4294901760, %v1575_v35  ;;  %v239_v31 = vand.u32 4294901760, %v1577_v36 }
  0x1a   :  { %1275 = vmatprep.subr.bf16.mxu1 %v1471_v4  ;;  %1347 = vmatprep.subr.bf16.mxu0 %v1471_v4  ;;  %v1672_v26 = vsub.f32 %v113_v15, %v161_v21  ;;  %v1674_v27 = vsub.f32 %v116_v16, %v164_v22  ;;  %v68_v33 = vsel %vm60_vm0, %v41_v23, 0  ;;  %v1692_v38 = vsub.f32 %v65_v20, %v1679_v29 }
  0x1b   :  { %v201_v37 = vand.u32 4294901760, %v1677_v28  ;;  %v1694_v40 = vand.u32 4294901760, %v68_v33  ;;  %v1696_v41 = vpack.c.bf16 %v164_v22, %v161_v21  ;;  %v233_v47 = vsub.f32 %v1575_v35, %v232_v30 }
  0x1c   :  { %v1336_v34 = vpack.c.bf16 %v1674_v27, %v1672_v26  ;;  %v240_v48 = vsub.f32 %v1577_v36, %v239_v31  ;;  %v211_v56 = vand.u32 4294901760, %v1692_v38  ;;  %v246_v1 = vand.u32 4294901760, %v1585_v39 }
  0x1d   :  { %v202_v55 = vsub.f32 %v1677_v28, %v201_v37  ;;  %v1703_v61 = vsub.f32 %v68_v33, %v1694_v40  ;;  %v234_v62 = vand.u32 4294901760, %v233_v47  ;;  %v253_v3 = vand.u32 4294901760, %v1589_v42 }
  0x1e   :  { %v241_v0 = vand.u32 4294901760, %v240_v48  ;;  %v212_v6 = vsub.f32 %v1692_v38, %v211_v56  ;;  %v1363_v11 = vpack.c.bf16 %v239_v31, %v232_v30  ;;  %v247_v13 = vsub.f32 %v1585_v39, %v246_v1 }
  0x1f   :  { %v203_v5 = vand.u32 4294901760, %v202_v55  ;;  %v221_v9 = vand.u32 4294901760, %v1703_v61  ;;  %v254_v15 = vsub.f32 %v1589_v42, %v253_v3  ;;  %v260_v23 = vand.u32 4294901760, %v1591_v43 }
  0x20   :  { %v1291_v10 = vpack.c.bf16 %v241_v0, %v234_v62  ;;  %v213_v16 = vand.u32 4294901760, %v212_v6  ;;  %v248_v21 = vand.u32 4294901760, %v247_v13  ;;  %v267_v33 = vand.u32 4294901760, %v1597_v45  ;;  %v43_v13 = vld [vmem:[%s1878_s2 + $0x8] sm:$0xff] }
  0x21   :  { %1277 = vmatpush3.bf16.xpose.msra.mxu1 %v1571_v32  ;;  %1349 = vmatpush3.bf16.xpose.msra.mxu0 %v1571_v32  ;;  %v222_v20 = vsub.f32 %v1703_v61, %v221_v9  ;;  %v255_v22 = vand.u32 4294901760, %v254_v15  ;;  %v1366_v30 = vpack.c.bf16 %v253_v3, %v246_v1  ;;  %v261_v47 = vsub.f32 %v1591_v43, %v260_v23  ;;  %v42_v1 = vld [vmem:[%s1878_s2] sm:$0xff]  ;;  %v44_v3 = vld [vmem:[%s1878_s2 + $0x10] sm:$0x3f] }
  0x22   :  { %1278 = vmatprep.subr.bf16.mxu1 %v1471_v4  ;;  %1350 = vmatprep.subr.bf16.mxu0 %v1471_v4  ;;  %v268_v48 = vsub.f32 %v1597_v45, %v267_v33  ;;  %v274_v55 = vand.u32 4294901760, %v1599_v46  ;;  %v281_v0 = vand.u32 4294901760, %v1603_v49  ;;  %v1474_v6 = vmov 0   ;;  %v848_v15 = vld [vmem:[%s1879_s3] sm:$0xff] }
  0x23   :  { %v223_v31 = vand.u32 4294901760, %v222_v20  ;;  %v262_v62 = vand.u32 4294901760, %v261_v47  ;;  %1445 = vset.pattern.permute.xlu0 %v1474_v6  ;;  %1446 = vset.pattern.permute.xlu1 %v1474_v6  ;;  %vm870_vm2 = vcmask 1045504  }
  0x24   :  { %47 = vperm.xlu0 %1445, %v42_v1   ;;  %57 = vperm.xlu1 %1446, %v44_v3   ;;  %v302_v1 = vand.u32 4294901760, %v1619_v59  ;;  %v309_v3 = vand.u32 4294901760, %v1621_v60 }
  0x26   :  { %v310_v6 = vsub.f32 %v1621_v60, %v309_v3 }
  0x28   :  { %52 = vperm.xlu0 %1445, %v43_v13   ;;  %853 = vperm.xlu1 %1446, %v848_v15   ;;  %v323_v13 = vand.u32 4294901760, %v1644_v8 }
  0x29   :  { %1280 = vmatpush3.bf16.xpose.msra.mxu1 %v1611_v53  ;;  %1352 = vmatpush3.bf16.xpose.msra.mxu0 %v1611_v53 }
  0x2a   :  { %1281 = vmatprep.subr.bf16.mxu1 %v1471_v4  ;;  %1353 = vmatprep.subr.bf16.mxu0 %v1471_v4 }
  0x31   :  { %1283 = vmatpush3.bf16.xpose.msra.mxu1 %v1637_v2  ;;  %1355 = vmatpush3.bf16.xpose.msra.mxu0 %v1637_v2 }
  0x32   :  { %1284 = vmatprep.subr.bf16.mxu1 %v1471_v4  ;;  %1356 = vmatprep.subr.bf16.mxu0 %v1471_v4 }
  0x39   :  { %1286 = vmatpush3.bf16.xpose.msra.mxu1 %v1666_v19  ;;  %1358 = vmatpush3.bf16.xpose.msra.mxu0 %v1666_v19 }
  0x3a   :  { %1287 = vmatprep.subr.bf16.mxu1 %v1471_v4  ;;  %1359 = vmatprep.subr.bf16.mxu0 %v1471_v4 }
  0x41   :  { %1289 = vmatpush3.bf16.xpose.msra.mxu1 %v1696_v41  ;;  %1361 = vmatpush3.bf16.xpose.msra.mxu0 %v1696_v41 }
  0x42   :  { %1290 = vmatprep.subr.bf16.mxu1 %v1471_v4  ;;  %1362 = vmatprep.subr.bf16.mxu0 %v1471_v4 }
  0x48   :  { %1053 = vmatmul.mubr.f32.vlgmr.msra.gmra.mrb[0].mxu1 %v203_v5  ;;  %1176 = vmatmul.mubr.f32.vlgmr.msra.gmra.mrb[0].mxu0 %v201_v37  ;;  %v1294_v37 = vpack.c.bf16 %v255_v22, %v248_v21  ;;  %v1369_v5 = vpack.c.bf16 %v267_v33, %v260_v23  ;;  %v288_v21 = vand.u32 4294901760, %v1605_v50  ;;  %v295_v22 = vand.u32 4294901760, %v1607_v51  ;;  %v849_v23 = vld [vmem:[%s1879_s3 + $0x8] sm:$0xff]  ;;  %v850_v33 = vld [vmem:[%s1879_s3 + $0x10] sm:$0x3f]  ;;  %s1475_s3 = smov [#allocation3]  }
  0x49   :  { %1292 = vmatpush3.bf16.xpose.msra.mxu1 %v1291_v10  ;;  %1364 = vmatpush3.bf16.xpose.msra.mxu0 %v1363_v11  ;;  %v275_v10 = vsub.f32 %v1599_v46, %v274_v55  ;;  %v282_v11 = vsub.f32 %v1603_v49, %v281_v0  ;;  %s898_s15 = sshll.u32 %s1475_s3, 4  ;;  %s899_s15 = int_to_ptr.vmem [resolvable:$true] %s898_s15 }
  0x4a   :  { %1293 = vmatprep.subr.bf16.mxu1 %v1471_v4  ;;  %1365 = vmatprep.subr.bf16.mxu0 %v1471_v4  ;;  %v296_v47 = vsub.f32 %v1607_v51, %v295_v22  ;;  %s1447_s16 = scalar_lea.vmem %s899_s15, 16  ;;  %s1451_s17 = scalar_lea.vmem %s899_s15, 32 }
  0x4b   :  { %1055 = vmatprep.mubr.msk.f32.mxu1 %vm1472_vm1, %v1473_v24  ;;  %1178 = vmatprep.mubr.msk.f32.mxu0 %vm1472_vm1, %v1473_v24  ;;  %v283_v20 = vand.u32 4294901760, %v282_v11  ;;  %v316_v11 = vand.u32 4294901760, %v1642_v7  ;;  %p1448_p0 = scmp.ne.s32.totalorder %s899_s15, %s1447_s16  ;;  %p1452_p1 = scmp.lt.s32.totalorder %s899_s15, %s899_s15 }
  0x4c   :  { %1056 = vmatmul.mubr.f32.gmra.mrb[2].mxu1 %v213_v16  ;;  %1179 = vmatmul.mubr.f32.gmra.mrb[2].mxu0 %v211_v56  ;;  %v269_v56 = vand.u32 4294901760, %v268_v48  ;;  %v276_v16 = vand.u32 4294901760, %v275_v10  ;;  %v879_v48 = vld [vmem:[#allocation2] sm:$0x1]  ;;  %v311_v10 = vand.u32 4294901760, %v310_v6  ;;  %p1453_p2 = scmp.lt.s32.totalorder %s1451_s17, %s1447_s16 }
  0x4d   :  { %1058 = vmatprep.mubr.msk.f32.mxu1 %vm1472_vm1, %v1473_v24  ;;  %1181 = vmatprep.mubr.msk.f32.mxu0 %vm1472_vm1, %v1473_v24 }
  0x4e   :  { %858 = vperm.xlu0 %1445, %v849_v23   ;;  %863 = vperm.xlu1 %1446, %v850_v33   ;;  %v330_v33 = vand.u32 4294901760, %v1672_v26  ;;  %p1454_p3 = por %p1453_p2, %p1452_p1 }
  0x50   :  { %1059 = vmatmul.mubr.f32.gmra.mrb[4].mxu1 %v223_v31  ;;  %1182 = vmatmul.mubr.f32.gmra.mrb[4].mxu0 %v221_v9  ;;  %v1297_v9 = vpack.c.bf16 %v269_v56, %v262_v62  ;;  %v1372_v31 = vpack.c.bf16 %v281_v0, %v274_v55  ;;  %v297_v56 = vand.u32 4294901760, %v296_v47  ;;  %v1375_v0 = vpack.c.bf16 %v295_v22, %v288_v21  ;;  %p1455_p4 = pnand %p1454_p3, %p1448_p0 }
  0x51   :  { %1295 = vmatpush3.bf16.xpose.msra.mxu1 %v1294_v37  ;;  %1367 = vmatpush3.bf16.xpose.msra.mxu0 %v1366_v30  ;;  %v1300_v30 = vpack.c.bf16 %v283_v20, %v276_v16  ;;  %v289_v37 = vsub.f32 %v1605_v50, %v288_v21  ;;  %v1378_v16 = vpack.c.bf16 %v309_v3, %v302_v1 }
  0x52   :  { %1296 = vmatprep.subr.bf16.mxu1 %v1471_v4  ;;  %1368 = vmatprep.subr.bf16.mxu0 %v1471_v4  ;;  %v317_v20 = vsub.f32 %v1642_v7, %v316_v11  ;;  %v324_v21 = vsub.f32 %v1644_v8, %v323_v13  ;;  %v331_v47 = vsub.f32 %v1672_v26, %v330_v33 }
  0x53   :  { %1093 = vmatprep.mubr.msk.f32.mxu1 %vm1472_vm1, %v1473_v24  ;;  %1216 = vmatprep.mubr.msk.f32.mxu0 %vm1472_vm1, %v1473_v24  ;;  %v290_v62 = vand.u32 4294901760, %v289_v37  ;;  %v1381_v37 = vpack.c.bf16 %v323_v13, %v316_v11 }
  0x54   :  { %882 = vperm.xlu0 %1445, %v879_v48   ;;  %v318_v22 = vand.u32 4294901760, %v317_v20  ;;  %v325_v23 = vand.u32 4294901760, %v324_v21 }
  0x55   :  { %v1303_v55 = vpack.c.bf16 %v297_v56, %v290_v62  ;;  %v332_v62 = vand.u32 4294901760, %v331_v47 }
  0x59   :  { %1298 = vmatpush3.bf16.xpose.msra.mxu1 %v1297_v9  ;;  %1370 = vmatpush3.bf16.xpose.msra.mxu0 %v1369_v5  ;;  %v303_v5 = vsub.f32 %v1619_v59, %v302_v1 }
  0x5a   :  { %1299 = vmatprep.subr.bf16.mxu1 %v1471_v4  ;;  %1371 = vmatprep.subr.bf16.mxu0 %v1471_v4 }
  0x5b   :  { %v304_v9 = vand.u32 4294901760, %v303_v5 }
  0x5d   :  { %v1306_v15 = vpack.c.bf16 %v311_v10, %v304_v9 }
  0x61   :  { %1301 = vmatpush3.bf16.xpose.msra.mxu1 %v1300_v30  ;;  %1373 = vmatpush3.bf16.xpose.msra.mxu0 %v1372_v31  ;;  %v337_v30 = vand.u32 4294901760, %v1674_v27  ;;  %v1309_v31 = vpack.c.bf16 %v325_v23, %v318_v22 }
  0x62   :  { %1302 = vmatprep.subr.bf16.mxu1 %v1471_v4  ;;  %1374 = vmatprep.subr.bf16.mxu0 %v1471_v4 }
  0x63   :  { %v338_v48 = vsub.f32 %v1674_v27, %v337_v30  ;;  %v1384_v3 = vpack.c.bf16 %v337_v30, %v330_v33  ;;  %v885_v27 = vlaneseq }
  0x65   :  { %v339_v56 = vand.u32 4294901760, %v338_v48 }
  0x67   :  { %v1312_v1 = vpack.c.bf16 %v339_v56, %v332_v62 }
  0x69   :  { %1304 = vmatpush3.bf16.xpose.msra.mxu1 %v1303_v55  ;;  %1376 = vmatpush3.bf16.xpose.msra.mxu0 %v1375_v0 }
  0x6a   :  { %1305 = vmatprep.subr.bf16.mxu1 %v1471_v4  ;;  %1377 = vmatprep.subr.bf16.mxu0 %v1471_v4 }
  0x71   :  { %1307 = vmatpush3.bf16.xpose.msra.mxu1 %v1306_v15  ;;  %1379 = vmatpush3.bf16.xpose.msra.mxu0 %v1378_v16 }
  0x72   :  { %1308 = vmatprep.subr.bf16.mxu1 %v1471_v4  ;;  %1380 = vmatprep.subr.bf16.mxu0 %v1471_v4 }
  0x79   :  { %1310 = vmatpush3.bf16.xpose.msra.mxu1 %v1309_v31  ;;  %1382 = vmatpush3.bf16.xpose.msra.mxu0 %v1381_v37 }
  0x7a   :  { %1311 = vmatprep.subr.bf16.mxu1 %v1471_v4  ;;  %1383 = vmatprep.subr.bf16.mxu0 %v1471_v4 }
  0x81   :  { %1313 = vmatpush3.bf16.xpose.msra.mxu1 %v1312_v1  ;;  %1385 = vmatpush3.bf16.xpose.msra.mxu0 %v1384_v3 }
  0x82   :  { %1314 = vmatprep.subr.bf16.mxu1 %v1471_v4  ;;  %1386 = vmatprep.subr.bf16.mxu0 %v1471_v4 }
  0x88   :  { %1094 = vmatmul.mubr.f32.vlgmr.msra.gmra.mrb[0].mxu1 %v1664_v18  ;;  %1217 = vmatmul.mubr.f32.vlgmr.msra.gmra.mrb[0].mxu0 %v1664_v18 }
  0x89   :  { %1316 = vmatpush3.bf16.xpose.msra.mxu1 %v1315_v44  ;;  %1388 = vmatpush3.bf16.xpose.msra.mxu0 %v1527_v12 }
  0x8a   :  { %1317 = vmatprep.subr.bf16.mxu1 %v1471_v4  ;;  %1389 = vmatprep.subr.bf16.mxu0 %v1471_v4 }
  0x8b   :  { %1096 = vmatprep.mubr.msk.f32.mxu1 %vm1472_vm1, %v1473_v24  ;;  %1219 = vmatprep.mubr.msk.f32.mxu0 %vm1472_vm1, %v1473_v24 }
  0x8c   :  { %1097 = vmatmul.mubr.f32.gmra.mrb[2].mxu1 %v1679_v29  ;;  %1220 = vmatmul.mubr.f32.gmra.mrb[2].mxu0 %v1679_v29 }
  0x8d   :  { %1099 = vmatprep.mubr.msk.f32.mxu1 %vm1472_vm1, %v1473_v24  ;;  %1222 = vmatprep.mubr.msk.f32.mxu0 %vm1472_vm1, %v1473_v24 }
  0x90   :  { %1100 = vmatmul.mubr.f32.gmra.mrb[4].mxu1 %v1694_v40  ;;  %1223 = vmatmul.mubr.f32.gmra.mrb[4].mxu0 %v1694_v40 }
  0x91   :  { %1319 = vmatpush3.bf16.xpose.msra.mxu1 %v1318_v52  ;;  %1391 = vmatpush3.bf16.xpose.msra.mxu0 %v1539_v17 }
  0x92   :  { %1320 = vmatprep.subr.bf16.mxu1 %v1471_v4  ;;  %1392 = vmatprep.subr.bf16.mxu0 %v1471_v4 }
  0x93   :  { %1134 = vmatprep.mubr.msk.f32.mxu1 %vm1472_vm1, %v1473_v24  ;;  %1257 = vmatprep.mubr.msk.f32.mxu0 %vm1472_vm1, %v1473_v24 }
  0x99   :  { %1322 = vmatpush3.bf16.xpose.msra.mxu1 %v1321_v54  ;;  %1394 = vmatpush3.bf16.xpose.msra.mxu0 %v1557_v25 }
  0x9a   :  { %1323 = vmatprep.subr.bf16.mxu1 %v1471_v4  ;;  %1395 = vmatprep.subr.bf16.mxu0 %v1471_v4 }
  0xa1   :  { %1325 = vmatpush3.bf16.xpose.msra.mxu1 %v1324_v57  ;;  %1397 = vmatpush3.bf16.xpose.msra.mxu0 %v1571_v32 }
  0xa2   :  { %1326 = vmatprep.subr.bf16.mxu1 %v1471_v4  ;;  %1398 = vmatprep.subr.bf16.mxu0 %v1471_v4 }
  0xa3   :  { %v58_v12 = vpop.permute.xlu1 %57 }
  0xa9   :  { %1328 = vmatpush3.bf16.xpose.msra.mxu1 %v1327_v58  ;;  %1400 = vmatpush3.bf16.xpose.msra.mxu0 %v1611_v53 }
  0xaa   :  { %1329 = vmatprep.subr.bf16.mxu1 %v1471_v4  ;;  %1401 = vmatprep.subr.bf16.mxu0 %v1471_v4 }
  0xb1   :  { %1331 = vmatpush3.bf16.xpose.msra.mxu1 %v1330_v63  ;;  %1403 = vmatpush3.bf16.xpose.msra.mxu0 %v1637_v2 }
  0xb2   :  { %1332 = vmatprep.subr.bf16.mxu1 %v1471_v4  ;;  %1404 = vmatprep.subr.bf16.mxu0 %v1471_v4 }
  0xb9   :  { %1334 = vmatpush3.bf16.xpose.msra.mxu1 %v1333_v14  ;;  %1406 = vmatpush3.bf16.xpose.msra.mxu0 %v1666_v19 }
  0xba   :  { %1335 = vmatprep.subr.bf16.mxu1 %v1471_v4  ;;  %1407 = vmatprep.subr.bf16.mxu0 %v1471_v4  ;;  %v48_v4 = vpop.permute.xlu0 %47 }
  0xbe   :  { %v53_v39 = vpop.permute.xlu0 %52 }
  0xc1   :  { %1337 = vmatpush3.bf16.xpose.msra.mxu1 %v1336_v34  ;;  %1409 = vmatpush3.bf16.xpose.msra.mxu0 %v1696_v41  ;;  %v886_v34 = vshrl.u32 %v885_v27, 7 }
  0xc3   :  { %v887_v41 = vsub.s32 0, %v886_v34 }
  0xc8   :  { %1135 = vmatmul.mubr.f32.vlgmr.msra.gmra.mrb[0].mxu1 %v1677_v28  ;;  %1258 = vmatmul.mubr.f32.vlgmr.msra.gmra.mrb[0].mxu0 %v1664_v18 }
  0xc9   :  { %1137 = vmatprep.mubr.msk.f32.mxu1 %vm1472_vm1, %v1473_v24  ;;  %1260 = vmatprep.mubr.msk.f32.mxu0 %vm1472_vm1, %v1473_v24 }
  0xcc   :  { %1138 = vmatmul.mubr.f32.gmra.mrb[2].mxu1 %v1692_v38  ;;  %1261 = vmatmul.mubr.f32.gmra.mrb[2].mxu0 %v1679_v29 }
  0xcd   :  { %1140 = vmatprep.mubr.msk.f32.mxu1 %vm1472_vm1, %v1473_v24  ;;  %1263 = vmatprep.mubr.msk.f32.mxu0 %vm1472_vm1, %v1473_v24  ;;  %v854_v24 = vpop.permute.xlu1 %853  ;;  %v859_v60 = vpop.permute.xlu0 %858 }
  0xd0   :  { %1141 = vmatmul.mubr.f32.gmra.mrb[4].mxu1 %v1703_v61  ;;  %1264 = vmatmul.mubr.f32.gmra.mrb[4].mxu0 %v1694_v40 }
  0xd1   :  { %v864_v18 = vpop.permute.xlu1 %863 }
  0xd3   :  { %v883_v55 = vpop.permute.xlu0 %882 }
  0xd4   :  { %v888_v5 = vrot.slane %v883_v55, %v887_v41 }
 0x19b   :  { %v492_v17 = vpop.f32.mrb[0].mxu1  ;;  %v829_v25 = vpop.f32.mrb[0].mxu0 }
 0x19c   :  { %v1410_v32 = vadd.f32 %v492_v17, %v48_v4  ;;  %v1136_v35 = vpop.f32.mrb[1].mxu1  ;;  %v1259_v36 = vpop.f32.mrb[1].mxu0 }
 0x19e   :  { %v1411_v42 = vadd.f32 %v1410_v32, %v829_v25 }
 0x19f   :  { %v499_v43 = vpop.f32.mrb[2].mxu1  ;;  %v835_v44 = vpop.f32.mrb[2].mxu0 }
 0x1a0   :  { %v1412_v45 = vadd.f32 %v499_v43, %v53_v39  ;;  %v1139_v46 = vpop.f32.mrb[3].mxu1  ;;  %v1262_v49 = vpop.f32.mrb[3].mxu0  ;;  %v845_v50 = vmax.f32 %v1411_v42, 0.0 }
 0x1a2   :  { %v1413_v51 = vadd.f32 %v1412_v45, %v835_v44  ;;  %v866_v63 = vmul.f32 %v854_v24, %v845_v50 }
 0x1a3   :  { %v506_v52 = vpop.f32.mrb[4].mxu1  ;;  %v841_v53 = vpop.f32.mrb[4].mxu0 }
 0x1a4   :  { %v846_v54 = vmax.f32 %v1413_v51, 0.0  ;;  %v1414_v57 = vadd.f32 %v506_v52, %v58_v12  ;;  %v1142_v58 = vpop.f32.mrb[5].mxu1  ;;  %v1265_v59 = vpop.f32.mrb[5].mxu0 }
 0x1a6   :  { %v867_v2 = vmul.f32 %v859_v60, %v846_v54  ;;  %v1415_v7 = vadd.f32 %v1414_v57, %v841_v53 }
 0x1a8   :  { %v869_v8 = vadd.f32 %v867_v2, %v866_v63  ;;  %v847_v14 = vmax.f32 %v1415_v7, 0.0 }
 0x1aa   :  { %v868_v19 = vmul.f32 %v864_v18, %v847_v14 }
 0x1ac   :  { %v871_v26 = vsel %vm870_vm2, %v868_v19, 0.0 }
 0x1ad   :  { %v872_v28 = vadd.f32 %v871_v26, %v869_v8 }
 0x1af   :  { %v873_v29 = vrot.slane %v872_v28, 4 }
 0x1b1   :  { %v874_v38 = vadd.f32 %v873_v29, %v872_v28 }
 0x1b3   :  { %v875_v40 = vrot.slane %v874_v38, 2 }
 0x1b5   :  { %v876_v61 = vadd.f32 %v875_v40, %v874_v38 }
 0x1b7   :  { %v877_v0 = vrot.slane %v876_v61, 1 }
 0x1b9   :  { %v878_v6 = vadd.f32 %v877_v0, %v876_v61 }
 0x1bb   :  { %v889_v9 = vadd.f32 %v888_v5, %v878_v6 }
 0x1bd   :  { %v890_v10 = vmax.f32 %v889_v9, 0.0 }
 0x1bf   :  { %891 = vst [vmem:[#allocation3] sm:$0x1] %v890_v10 }
 0x1c0   :  { %1458 = shalt.err (!%p1455_p4)
}
 0x1c1   :  { %s1459_s20 = scalar_lea.hbm %s1881_s5, 16 }
 0x1c2   :  { %p1460_p5 = scmp.ne.s32.totalorder %s1881_s5, %s1459_s20  ;;  %p1463_p6 = scmp.lt.u32.totalorder %s1459_s20, %s1881_s5 }
 0x1c4   :  { %p1465_p7 = pnand %p1463_p6, %p1460_p5 }
 0x1c6   :  { %1468 = shalt.err (!%p1465_p7)
}
 0x1c7   :  { %901 = dma.vmem_to_hbm [thread:$0]  %s899_s15, 16, %s1881_s5, [#allocation4]  }
 0x1c8   :  { %1469 = dma.done.wait [#allocation4], 16  }
 0x1c9   :  { %1470 = vsyncadd [#allocation4], 4294967280 }
 0x1ca   :  { %905 = vsyncpa [#allocation4], 1 }

</bundles_post_ra>
